<compile_context>
chip_gen: v5e
topology: v5e:2x2
jax: 0.10.0
libtpu: 0.0.40
codegen_flags: <defaults>
</compile_context>

<pallas_src>
from itertools import combinations

import numpy as np
import jax
import jax.numpy as jnp
from jax.experimental import pallas as pl
from jax.experimental.pallas import tpu as pltpu


def generate_pairs(ranges=range(1, 100), mask=None, order=2):
    """Mirror of the PyTorch helper: returns `order` parallel index lists."""
    res = [[] for _ in range(order)]
    for i, pair in enumerate(combinations(ranges, order)):
        if mask is None or len(mask) == 0 or mask[i] == 1:
            for j in range(order):
                res[j].append(pair[j])
    return res


def _fm3_kernel(xr_ref, s1_ref, s2_ref, s3w_ref, out_ref):
    # xr:  (TB*D, F)   float32  -- batch-tile of x, fields on lanes
    # s1/s2: (F, P_pad) one-hot field-selection matrices (zero-padded columns)
    # s3w: (F, P_pad)  one-hot * edge_weight (weights folded in, padding = 0)
    # out: (TB, 1)
    xr = xr_ref[...]

    # Field selection as MXU matmuls -> lane-dense (TB*D, P_pad) tiles.
    xa = jnp.dot(xr, s1_ref[...], preferred_element_type=jnp.float32)
    xb = jnp.dot(xr, s2_ref[...], preferred_element_type=jnp.float32)
    xc = jnp.dot(xr, s3w_ref[...], preferred_element_type=jnp.float32)

    # Third-order interaction, already weighted (weights folded into s3w).
    q = xa * xb * xc                                  # (TB*D, P_pad)

    tb = out_ref.shape[0]
    d = xr_ref.shape[0] // tb
    # Split the leading (batch*embed) axis; last dim untouched and d % 8 == 0
    # in practice, so this reshape is layout-clean (no cross-tile relayout).
    q3 = q.reshape(tb, d, q.shape[-1])                # (TB, D, P_pad)
    s = jnp.sum(q3, axis=2)                           # lane reduce  -> (TB, D)
    out_ref[...] = jnp.sum(s, axis=1, keepdims=True).astype(out_ref.dtype)


def level_3_matrix_forward(x, third_edge_weights, comb_mask_third=None,
                           block_batch=None):
    """x: (B, F, D) float32, third_edge_weights: (P,) -> (B, 1) float32."""
    B, F, D = x.shape
    first, second, third = generate_pairs(range(F), mask=comb_mask_third, order=3)
    P = len(first)

    w = jnp.asarray(third_edge_weights, jnp.float32).reshape(-1)
    assert w.shape[0] == P, "edge weights must have one entry per field triple"

    # Pad the triple axis to a multiple of 128 for lane-dense intermediates.
    P_pad = ((P + 127) // 128) * 128

    # Static one-hot selection matrices; padded columns are all-zero so they
    # contribute nothing to the final sums.
    s1 = np.zeros((F, P_pad), np.float32)
    s2 = np.zeros((F, P_pad), np.float32)
    s3 = np.zeros((F, P_pad), np.float32)
    cols = np.arange(P)
    s1[np.asarray(first), cols] = 1.0
    s2[np.asarray(second), cols] = 1.0
    s3[np.asarray(third), cols] = 1.0
    w_pad = jnp.zeros((P_pad,), jnp.float32).at[:P].set(w)
    s3w = jnp.asarray(s3) * w_pad[None, :]            # fold edge weights in

    if block_batch is None:
        block_batch = min(B, 256)
    TB = block_batch
    assert B % TB == 0, "block_batch must divide B (pad the batch if needed)"
    rows = TB * D                                     # rows per tile of (B*D, F)
    if TB < B:
        assert rows % 8 == 0 and TB % 8 == 0, "batch tile must be sublane-aligned"

    # One cheap XLA transpose+reshape so the kernel reads x once, 2-D, with the
    # field axis (the contraction axis of the selection matmuls) last.
    xr = jnp.swapaxes(x.astype(jnp.float32), 1, 2).reshape(B * D, F)

    flops = 3 * 2 * B * D * F * P_pad + 3 * B * D * P_pad
    bytes_accessed = xr.size * 4 + 3 * F * P_pad * 4 + B * 4

    out = pl.pallas_call(
        _fm3_kernel,
        out_shape=jax.ShapeDtypeStruct((B, 1), jnp.float32),
        grid=(B // TB,),
        in_specs=[
            pl.BlockSpec((rows, F), lambda i: (i, 0)),     # batch tile of x
            pl.BlockSpec((F, P_pad), lambda i: (0, 0)),    # selection (first)
            pl.BlockSpec((F, P_pad), lambda i: (0, 0)),    # selection (second)
            pl.BlockSpec((F, P_pad), lambda i: (0, 0)),    # selection*weight (third)
        ],
        out_specs=pl.BlockSpec((TB, 1), lambda i: (i, 0)),
        compiler_params=pltpu.CompilerParams(
            dimension_semantics=("parallel",),             # no cross-tile state
            vmem_limit_bytes=32 * 1024 * 1024,             # fits v7x (64 MiB) too
        ),
        cost_estimate=pl.CostEstimate(
            flops=flops, transcendentals=0, bytes_accessed=bytes_accessed),
    )(xr, jnp.asarray(s1), jnp.asarray(s2), s3w)
    return out


def _reference_forward(x, third_edge_weights, comb_mask_third=None):
    """Pure-JAX mirror of the PyTorch forward (gather formulation)."""
    first, second, third = generate_pairs(range(x.shape[1]),
                                          mask=comb_mask_third, order=3)
    xt = jnp.transpose(x, (1, 0, 2))
    fe = jnp.transpose(xt[jnp.asarray(first)], (1, 0, 2))
    se = jnp.transpose(xt[jnp.asarray(second)], (1, 0, 2))
    te = jnp.transpose(xt[jnp.asarray(third)], (1, 0, 2))
    l3 = jnp.sum(fe * se * te, axis=-1)
    l3 = l3 * third_edge_weights[None, :]
    return jnp.sum(l3, axis=-1, keepdims=True)


if __name__ == "__main__":
    # Small but representative shapes: batch=16, num_inputs(fields)=5, embed=16.
    # Module quirk: __init__ sizes the edge weights from the ORDER-2 pair count
    # while forward consumes ORDER-3 triples; F=5 makes both equal
    # (C(5,2)=C(5,3)=10), the only configuration where the PyTorch module
    # broadcasts cleanly -- mirrored here.
    B, F, D = 16, 5, 16
    pairs2 = generate_pairs(range(F))            # order=2 (module __init__ length)
    triples = generate_pairs(range(F), order=3)  # order=3 (forward)
    length = len(pairs2[0])
    assert length == len(triples[0])

    key = jax.random.PRNGKey(0)
    kx, kw = jax.random.split(key)
    x = jax.random.normal(kx, (B, F, D), dtype=jnp.float32)

    # third_edge_weights init: uniform(base-0.001, base+0.001) then L2-normalize
    # (nn.functional.normalize(p=2, dim=0)); forward uses this (unpruned_mask) copy.
    weight_base_third = 0.6
    w = jax.random.uniform(kw, (length,), minval=weight_base_third - 0.001,
                           maxval=weight_base_third + 0.001, dtype=jnp.float32)
    w = w / jnp.linalg.norm(w)

    out = level_3_matrix_forward(x, w, block_batch=8)   # grid=(2,) -> pipelined
    out = jax.block_until_ready(out)

    ref = _reference_forward(x, w)
    assert out.shape == (B, 1)
    assert jnp.allclose(out, ref, atol=1e-3, rtol=1e-3), \
        float(jnp.max(jnp.abs(out - ref)))

    print("KERNEL_OK")
</pallas_src>

<mosaic_0001>
module attributes {stable_mosaic.version = 11 : i64} {
  func.func @_fm3_kernel(%arg0: i32, %arg1: memref<128x5xf32, #tpu.memory_space<vmem>>, %arg2: memref<5x128xf32, #tpu.memory_space<vmem>>, %arg3: memref<5x128xf32, #tpu.memory_space<vmem>>, %arg4: memref<5x128xf32, #tpu.memory_space<vmem>>, %arg5: memref<8x1xf32, #tpu.memory_space<vmem>>) attributes {dimension_semantics = [#tpu.dimension_semantics<parallel>], iteration_bounds = array<i64: 2>, scalar_prefetch = 0 : i64, scratch_operands = 0 : i64, tpu.core_type = #tpu.core_type<tc>, window_params = [{transform_indices = @transform_0, window_bounds = array<i64: 128, 5>}, {pipeline_mode = #tpu.pipeline_mode<synchronous>, transform_indices = @transform_1, window_bounds = array<i64: 5, 128>}, {pipeline_mode = #tpu.pipeline_mode<synchronous>, transform_indices = @transform_2, window_bounds = array<i64: 5, 128>}, {pipeline_mode = #tpu.pipeline_mode<synchronous>, transform_indices = @transform_3, window_bounds = array<i64: 5, 128>}, {transform_indices = @transform_4, window_bounds = array<i64: 8, 1>}]} {
    %c0 = arith.constant 0 : index
    %c0_0 = arith.constant 0 : index
    %0 = vector.load %arg1[%c0, %c0_0] : memref<128x5xf32, #tpu.memory_space<vmem>>, vector<128x5xf32>
    %c0_1 = arith.constant 0 : index
    %c0_2 = arith.constant 0 : index
    %1 = vector.load %arg2[%c0_1, %c0_2] : memref<5x128xf32, #tpu.memory_space<vmem>>, vector<5x128xf32>
    %cst = arith.constant dense<0.000000e+00> : vector<128x128xf32>
    %2 = tpu.matmul %0, %1, %cst {dimension_numbers = #tpu.dot_dimension_numbers<[1], [0], [0], [1], [0, 0, 1, 1], [], []>} : vector<128x5xf32>, vector<5x128xf32>, vector<128x128xf32> -> vector<128x128xf32>
    %c0_3 = arith.constant 0 : index
    %c0_4 = arith.constant 0 : index
    %3 = vector.load %arg3[%c0_3, %c0_4] : memref<5x128xf32, #tpu.memory_space<vmem>>, vector<5x128xf32>
    %cst_5 = arith.constant dense<0.000000e+00> : vector<128x128xf32>
    %4 = tpu.matmul %0, %3, %cst_5 {dimension_numbers = #tpu.dot_dimension_numbers<[1], [0], [0], [1], [0, 0, 1, 1], [], []>} : vector<128x5xf32>, vector<5x128xf32>, vector<128x128xf32> -> vector<128x128xf32>
    %c0_6 = arith.constant 0 : index
    %c0_7 = arith.constant 0 : index
    %5 = vector.load %arg4[%c0_6, %c0_7] : memref<5x128xf32, #tpu.memory_space<vmem>>, vector<5x128xf32>
    %cst_8 = arith.constant dense<0.000000e+00> : vector<128x128xf32>
    %6 = tpu.matmul %0, %5, %cst_8 {dimension_numbers = #tpu.dot_dimension_numbers<[1], [0], [0], [1], [0, 0, 1, 1], [], []>} : vector<128x5xf32>, vector<5x128xf32>, vector<128x128xf32> -> vector<128x128xf32>
    %7 = arith.mulf %2, %4 : vector<128x128xf32>
    %8 = arith.mulf %7, %6 : vector<128x128xf32>
    %9 = vector.shape_cast %8 : vector<128x128xf32> to vector<8x16x128xf32>
    %cst_9 = arith.constant dense<0.000000e+00> : vector<8x16xf32>
    %10 = vector.multi_reduction <add>, %9, %cst_9 [2] : vector<8x16x128xf32> to vector<8x16xf32>
    %cst_10 = arith.constant dense<0.000000e+00> : vector<8xf32>
    %11 = vector.multi_reduction <add>, %10, %cst_10 [1] : vector<8x16xf32> to vector<8xf32>
    %12 = vector.shape_cast %11 : vector<8xf32> to vector<8x1xf32>
    %c0_11 = arith.constant 0 : index
    %c0_12 = arith.constant 0 : index
    %13 = vector.load %arg5[%c0_11, %c0_12] : memref<8x1xf32, #tpu.memory_space<vmem>>, vector<8x1xf32>
    tpu.vector_store %arg5[%c0_11, %c0_12], %12 {strides = array<i32>} : memref<8x1xf32, #tpu.memory_space<vmem>>, vector<8x1xf32>,
    return
  }
  func.func @transform_0(%arg0: i32) -> (i32, i32) {
    %c0_i32 = arith.constant 0 : i32
    %c0_i32_0 = arith.constant 0 : i32
    return %arg0, %c0_i32 : i32, i32
  }
  func.func @transform_1(%arg0: i32) -> (i32, i32) {
    %c0_i32 = arith.constant 0 : i32
    %c0_i32_0 = arith.constant 0 : i32
    %c0_i32_1 = arith.constant 0 : i32
    return %c0_i32, %c0_i32_0 : i32, i32
  }
  func.func @transform_2(%arg0: i32) -> (i32, i32) {
    %c0_i32 = arith.constant 0 : i32
    %c0_i32_0 = arith.constant 0 : i32
    %c0_i32_1 = arith.constant 0 : i32
    return %c0_i32, %c0_i32_0 : i32, i32
  }
  func.func @transform_3(%arg0: i32) -> (i32, i32) {
    %c0_i32 = arith.constant 0 : i32
    %c0_i32_0 = arith.constant 0 : i32
    %c0_i32_1 = arith.constant 0 : i32
    return %c0_i32, %c0_i32_0 : i32, i32
  }
  func.func @transform_4(%arg0: i32) -> (i32, i32) {
    %c0_i32 = arith.constant 0 : i32
    %c0_i32_0 = arith.constant 0 : i32
    return %arg0, %c0_i32 : i32, i32
  }
}

</mosaic_0001>

<bundles_post_ra>
// kernel: tpu_custom_call.1
= control target key start
LH: loop header
LB: loop body
LE: loop exit
PB: predicated region body
PF: predicated region fallthrough
CT: control target
= control target key end

     0   :  { %s758_s15 = smov 0   ;;  %s876_s0 = inlined_call_operand.vmem [shape: f32[256,5], index: 0, kind: input, shape index: {}]   ;;  %s877_s1 = inlined_call_operand.vmem [shape: f32[5,128], index: 1, kind: input, shape index: {}]   ;;  %s878_s2 = inlined_call_operand.vmem [shape: f32[5,128], index: 2, kind: input, shape index: {}]   ;;  %s879_s3 = inlined_call_operand.vmem [shape: f32[5,128], index: 3, kind: input, shape index: {}]   ;;  %s880_s4 = inlined_call_operand.vmem [shape: f32[16,1], index: 4, kind: output, shape index: {}]  }
   0x1 LB: > { %s764_s16 = sadd.s32 4294967295, %s731_s15   ;;  %p657_p0 = scmp.ge.s32.totalorder %s731_s15, 1  ;;  %s731_s15 = sphi %s758_s15, %s14_s15  }
   0x2   : > { %p163_p1 = scmp.lt.s32.totalorder %s731_s15, 3 }
   0x4   : > { %p164_p2 = pnand %p657_p0, %p163_p1 }
   0x5   : > { %s658_s21 = sshll.u32 (!%p164_p2), %s764_s16, 4  ;;  %p194_p4 = scmp.lt.s32.totalorder (!%p164_p2), %s764_s16, 1 }
   0x6   : > { %167 = sbr.rel (%p164_p2) target bundleno = 484 (0x1e4), region = 36  ;;  %p189_p3 = scmp.lt.s32.totalorder (!%p164_p2), %s658_s21, 31 }
   0xb   : > { %v214_v0 = vld [vmem:[%s877_s1] sm:$0x1f]  ;;  %vm264_vm0 = vcmask 1044480   ;;  %s882_s21 = smov (!%p189_p3, %s658_s21), 31  ;;  %vm215_vm1 = vcmask 39936   ;;  %vm556_vm2 = vcmask 130112  }
   0xc   : > { %v402_v1 = vld [vmem:[%s879_s3] sm:$0x1f]  ;;  %714 = vmatpush.msk.msra.mxu3 %vm264_vm0, %v214_v0  ;;  %661 = vmatpush.msk.msra.mxu0 %vm264_vm0, %v214_v0  ;;  %s659_s24 = sshll.u32 %s882_s21, 3  ;;  %vm579_vm3 = vcmask 1041409   ;;  %vm581_vm4 = vcmask 1042434   ;;  %vm583_vm5 = vcmask 1043459  }
   0xd   : > { %695 = vmatpush.msk.msra.mxu2 %vm264_vm0, %v402_v1  ;;  %v333_v2 = vld [vmem:[%s878_s2] sm:$0x1f]  ;;  %s786_s27 = scalar_lea.vmem %s876_s0, %s659_s24  ;;  %vm585_vm6 = vcmask 1044484   ;;  %vm587_vm7 = vcmask 1045509   ;;  %vm589_vm8 = vcmask 1046534   ;;  %vm591_vm9 = vcmask 1047559  }
   0xe   : > { %678 = vmatpush.msk.msra.mxu1 %vm264_vm0, %v333_v2  ;;  %715 = vmatpush.msk.msrb.mxu3 %vm264_vm0, %v333_v2  ;;  %v210_v3 = vld [vmem:[%s786_s27 + $0x60] sm:$0xff]  ;;  %v211_v5 = vld [vmem:[%s786_s27 + $0x68] sm:$0xff]  ;;  %v212_v7 = vld [vmem:[%s786_s27 + $0x70] sm:$0xff]  ;;  %vm594_vm10 = vcmask 130048   ;;  %s884_s16 = smov (!%p194_p4, %s764_s16), 1  ;;  %vm598_vm11 = vcmask 7168  }
   0xf   : > { %v198_v4 = vld [vmem:[%s786_s27] sm:$0xff]  ;;  %674 = vmatmul.msk.f32.vlgmr.msra.gmra.mxu3 %vm215_vm1, %v210_v3  ;;  %v199_v6 = vld [vmem:[%s786_s27 + $0x8] sm:$0xff]  ;;  %v200_v8 = vld [vmem:[%s786_s27 + $0x10] sm:$0xff]  ;;  %s660_s28 = sshll.u32 %s884_s16, 3 }
  0x10   : > { %696 = vmatmul.msk.f32.vlgmr.msra.gmra.mxu2 %vm215_vm1, %v198_v4  ;;  %662 = vmatmul.msk.f32.vlgmr.msra.gmra.mxu0 %vm215_vm1, %v198_v4  ;;  %v213_v9 = vld [vmem:[%s786_s27 + $0x78] sm:$0xff]  ;;  %v202_v11 = vld [vmem:[%s786_s27 + $0x20] sm:$0xff]  ;;  %v203_v12 = vld [vmem:[%s786_s27 + $0x28] sm:$0xff]  ;;  %s197_s5 = scalar_lea.vmem %s880_s4, %s660_s28 }
  0x11   : > { %679 = vmatmul.msk.f32.vlgmr.msra.gmra.mxu1 %vm215_vm1, %v198_v4  ;;  %716 = vmatpush.msk.msra.mxu3 %vm264_vm0, %v402_v1  ;;  %v201_v10 = vld [vmem:[%s786_s27 + $0x18] sm:$0xff]  ;;  %v204_v13 = vld [vmem:[%s786_s27 + $0x30] sm:$0xff]  ;;  %v206_v15 = vld [vmem:[%s786_s27 + $0x40] sm:$0xff] }
  0x12   : > { %v205_v14 = vld [vmem:[%s786_s27 + $0x38] sm:$0xff]  ;;  %v207_v16 = vld [vmem:[%s786_s27 + $0x48] sm:$0xff]  ;;  %v208_v17 = vld [vmem:[%s786_s27 + $0x50] sm:$0xff] }
  0x13   : > { %v209_v18 = vld [vmem:[%s786_s27 + $0x58] sm:$0xff] }
  0x17   : > { %675 = vmatmul.msk.f32.gmra.mxu3 %vm215_vm1, %v211_v5 }
  0x18   : > { %697 = vmatmul.msk.f32.gmra.mxu2 %vm215_vm1, %v199_v6  ;;  %663 = vmatmul.msk.f32.gmra.mxu0 %vm215_vm1, %v199_v6 }
  0x19   : > { %680 = vmatmul.msk.f32.gmra.mxu1 %vm215_vm1, %v199_v6 }
  0x1f   : > { %676 = vmatmul.msk.f32.gmra.mxu3 %vm215_vm1, %v212_v7 }
  0x20   : > { %698 = vmatmul.msk.f32.gmra.mxu2 %vm215_vm1, %v200_v8  ;;  %664 = vmatmul.msk.f32.gmra.mxu0 %vm215_vm1, %v200_v8 }
  0x21   : > { %681 = vmatmul.msk.f32.gmra.mxu1 %vm215_vm1, %v200_v8 }
  0x27   : > { %677 = vmatmul.msk.f32.gmra.mxu3 %vm215_vm1, %v213_v9 }
  0x28   : > { %699 = vmatmul.msk.f32.gmra.mxu2 %vm215_vm1, %v201_v10  ;;  %665 = vmatmul.msk.f32.gmra.mxu0 %vm215_vm1, %v201_v10 }
  0x29   : > { %682 = vmatmul.msk.f32.gmra.mxu1 %vm215_vm1, %v201_v10 }
  0x2f   : > { %691 = vmatmul.msk.f32.vlgmr.msrb.gmra.mxu3 %vm215_vm1, %v210_v3 }
  0x30   : > { %700 = vmatmul.msk.f32.gmra.mxu2 %vm215_vm1, %v202_v11  ;;  %666 = vmatmul.msk.f32.gmra.mxu0 %vm215_vm1, %v202_v11 }
  0x31   : > { %683 = vmatmul.msk.f32.gmra.mxu1 %vm215_vm1, %v202_v11 }
  0x37   : > { %692 = vmatmul.msk.f32.gmra.mxu3 %vm215_vm1, %v211_v5 }
  0x38   : > { %701 = vmatmul.msk.f32.gmra.mxu2 %vm215_vm1, %v203_v12  ;;  %667 = vmatmul.msk.f32.gmra.mxu0 %vm215_vm1, %v203_v12 }
  0x39   : > { %684 = vmatmul.msk.f32.gmra.mxu1 %vm215_vm1, %v203_v12 }
  0x3f   : > { %693 = vmatmul.msk.f32.gmra.mxu3 %vm215_vm1, %v212_v7 }
  0x40   : > { %702 = vmatmul.msk.f32.gmra.mxu2 %vm215_vm1, %v204_v13  ;;  %668 = vmatmul.msk.f32.gmra.mxu0 %vm215_vm1, %v204_v13 }
  0x41   : > { %685 = vmatmul.msk.f32.gmra.mxu1 %vm215_vm1, %v204_v13 }
  0x47   : > { %694 = vmatmul.msk.f32.gmra.mxu3 %vm215_vm1, %v213_v9 }
  0x48   : > { %703 = vmatmul.msk.f32.gmra.mxu2 %vm215_vm1, %v205_v14  ;;  %669 = vmatmul.msk.f32.gmra.mxu0 %vm215_vm1, %v205_v14 }
  0x49   : > { %686 = vmatmul.msk.f32.gmra.mxu1 %vm215_vm1, %v205_v14 }
  0x4f   : > { %708 = vmatmul.msk.f32.vlgmr.msra.gmra.mxu3 %vm215_vm1, %v210_v3 }
  0x50   : > { %704 = vmatmul.msk.f32.gmra.mxu2 %vm215_vm1, %v206_v15  ;;  %670 = vmatmul.msk.f32.gmra.mxu0 %vm215_vm1, %v206_v15 }
  0x51   : > { %687 = vmatmul.msk.f32.gmra.mxu1 %vm215_vm1, %v206_v15 }
  0x57   : > { %709 = vmatmul.msk.f32.gmra.mxu3 %vm215_vm1, %v211_v5 }
  0x58   : > { %705 = vmatmul.msk.f32.gmra.mxu2 %vm215_vm1, %v207_v16  ;;  %671 = vmatmul.msk.f32.gmra.mxu0 %vm215_vm1, %v207_v16 }
  0x59   : > { %688 = vmatmul.msk.f32.gmra.mxu1 %vm215_vm1, %v207_v16 }
  0x5f   : > { %710 = vmatmul.msk.f32.gmra.mxu3 %vm215_vm1, %v212_v7 }
  0x60   : > { %706 = vmatmul.msk.f32.gmra.mxu2 %vm215_vm1, %v208_v17  ;;  %672 = vmatmul.msk.f32.gmra.mxu0 %vm215_vm1, %v208_v17 }
  0x61   : > { %689 = vmatmul.msk.f32.gmra.mxu1 %vm215_vm1, %v208_v17 }
  0x67   : > { %711 = vmatmul.msk.f32.gmra.mxu3 %vm215_vm1, %v213_v9 }
  0x68   : > { %707 = vmatmul.msk.f32.gmra.mxu2 %vm215_vm1, %v209_v18  ;;  %673 = vmatmul.msk.f32.gmra.mxu0 %vm215_vm1, %v209_v18 }
  0x69   : > { %690 = vmatmul.msk.f32.gmra.mxu1 %vm215_vm1, %v209_v18 }
  0x8d   : > { %v285_v19 = vpop.f32.mrf.mxu0 }
  0x8e   : > { %v354_v20 = vpop.f32.mrf.mxu1 }
  0x8f   : > { %v471_v21 = vmul.f32 %v354_v20, %v285_v19 }
  0x92   : > { %v321_v22 = vpop.f32.mrf.mxu3 }
  0x93   : > { %v423_v23 = vpop.f32.mrf.mxu2 }
  0x94   : > { %v487_v24 = vmul.f32 %v471_v21, %v423_v23 }
  0x95   : > { %v288_v25 = vpop.f32.mrf.mxu0 }
  0x96   : > { %503 = vadd.xlane.f32.xlu0 %v487_v24  ;;  %v357_v26 = vpop.f32.mrf.mxu1 }
  0x97   : > { %v472_v27 = vmul.f32 %v357_v26, %v288_v25 }
  0x9a   : > { %v853_v28 = vpop.f32.mrf.mxu3 }
  0x9b   : > { %v426_v29 = vpop.f32.mrf.mxu2 }
  0x9c   : > { %v488_v30 = vmul.f32 %v472_v27, %v426_v29 }
  0x9d   : > { %v291_v31 = vpop.f32.mrf.mxu0 }
  0x9e   : > { %505 = vadd.xlane.f32.xlu0 %v488_v30  ;;  %v360_v32 = vpop.f32.mrf.mxu1 }
  0x9f   : > { %v473_v33 = vmul.f32 %v360_v32, %v291_v31 }
  0xa2   : > { %v855_v34 = vpop.f32.mrf.mxu3 }
  0xa3   : > { %v429_v35 = vpop.f32.mrf.mxu2 }
  0xa4   : > { %v489_v36 = vmul.f32 %v473_v33, %v429_v35 }
  0xa5   : > { %v294_v37 = vpop.f32.mrf.mxu0 }
  0xa6   : > { %507 = vadd.xlane.f32.xlu1 %v489_v36  ;;  %v363_v38 = vpop.f32.mrf.mxu1 }
  0xa7   : > { %v474_v39 = vmul.f32 %v363_v38, %v294_v37 }
  0xaa   : > { %v330_v40 = vpop.f32.mrf.mxu3 }
  0xab   : > { %v432_v41 = vpop.f32.mrf.mxu2 }
  0xac   : > { %v490_v42 = vmul.f32 %v474_v39, %v432_v41 }
  0xad   : > { %v297_v43 = vpop.f32.mrf.mxu0 }
  0xae   : > { %509 = vadd.xlane.f32.xlu1 %v490_v42  ;;  %v366_v44 = vpop.f32.mrf.mxu1 }
  0xaf   : > { %v475_v45 = vmul.f32 %v366_v44, %v297_v43 }
  0xb2   : > { %v390_v46 = vpop.f32.mrf.mxu3 }
  0xb3   : > { %v435_v47 = vpop.f32.mrf.mxu2  ;;  %v483_v6 = vmul.f32 %v390_v46, %v321_v22 }
  0xb4   : > { %v491_v48 = vmul.f32 %v475_v45, %v435_v47  ;;  %v551_v45 = vlaneseq }
  0xb5   : > { %v300_v49 = vpop.f32.mrf.mxu0 }
  0xb6   : > { %511 = vadd.xlane.f32.xlu2 %v491_v48  ;;  %v369_v50 = vpop.f32.mrf.mxu1  ;;  %v552_v48 = vand.u32 127, %v551_v45 }
  0xb7   : > { %v476_v51 = vmul.f32 %v369_v50, %v300_v49 }
  0xb8   : > { %v554_v49 = vadd.s32 4294967288, %v552_v48 }
  0xba   : > { %v393_v52 = vpop.f32.mrf.mxu3 }
  0xbb   : > { %v438_v53 = vpop.f32.mrf.mxu2  ;;  %v484_v26 = vmul.f32 %v393_v52, %v853_v28 }
  0xbc   : > { %v492_v54 = vmul.f32 %v476_v51, %v438_v53 }
  0xbd   : > { %v303_v55 = vpop.f32.mrf.mxu0 }
  0xbe   : > { %513 = vadd.xlane.f32.xlu2 %v492_v54  ;;  %v372_v56 = vpop.f32.mrf.mxu1 }
  0xbf   : > { %v477_v57 = vmul.f32 %v372_v56, %v303_v55 }
  0xc2   : > { %v396_v58 = vpop.f32.mrf.mxu3 }
  0xc3   : > { %v441_v59 = vpop.f32.mrf.mxu2  ;;  %v485_v35 = vmul.f32 %v396_v58, %v855_v34 }
  0xc4   : > { %v493_v60 = vmul.f32 %v477_v57, %v441_v59 }
  0xc5   : > { %v306_v61 = vpop.f32.mrf.mxu0 }
  0xc6   : > { %515 = vadd.xlane.f32.xlu0 %v493_v60  ;;  %v375_v62 = vpop.f32.mrf.mxu1 }
  0xc7   : > { %v478_v63 = vmul.f32 %v375_v62, %v306_v61 }
  0xca   : > { %v399_v0 = vpop.f32.mrf.mxu3 }
  0xcb   : > { %v444_v1 = vpop.f32.mrf.mxu2  ;;  %v486_v27 = vmul.f32 %v399_v0, %v330_v40 }
  0xcc   : > { %v494_v2 = vmul.f32 %v478_v63, %v444_v1 }
  0xcd   : > { %v309_v3 = vpop.f32.mrf.mxu0 }
  0xce   : > { %517 = vadd.xlane.f32.xlu1 %v494_v2  ;;  %v378_v4 = vpop.f32.mrf.mxu1 }
  0xcf   : > { %v479_v5 = vmul.f32 %v378_v4, %v309_v3 }
  0xd2   : > { %v459_v8 = vpop.f32.mrf.mxu3 }
  0xd3   : > { %v447_v7 = vpop.f32.mrf.mxu2  ;;  %v499_v10 = vmul.f32 %v483_v6, %v459_v8 }
  0xd4   : > { %v495_v9 = vmul.f32 %v479_v5, %v447_v7 }
  0xd5   : > { %527 = vadd.xlane.f32.xlu0 %v499_v10  ;;  %v312_v11 = vpop.f32.mrf.mxu0 }
  0xd6   : > { %519 = vadd.xlane.f32.xlu2 %v495_v9  ;;  %v381_v12 = vpop.f32.mrf.mxu1 }
  0xd7   : > { %v480_v13 = vmul.f32 %v381_v12, %v312_v11 }
  0xda   : > { %v462_v15 = vpop.f32.mrf.mxu3 }
  0xdb   : > { %v450_v14 = vpop.f32.mrf.mxu2  ;;  %v500_v31 = vmul.f32 %v484_v26, %v462_v15 }
  0xdc   : > { %v496_v16 = vmul.f32 %v480_v13, %v450_v14 }
  0xdd   : > { %v315_v17 = vpop.f32.mrf.mxu0 }
  0xde   : > { %521 = vadd.xlane.f32.xlu0 %v496_v16  ;;  %v384_v18 = vpop.f32.mrf.mxu1 }
  0xdf   : > { %v481_v19 = vmul.f32 %v384_v18, %v315_v17 }
  0xe2   : > { %v465_v21 = vpop.f32.mrf.mxu3 }
  0xe3   : > { %v453_v20 = vpop.f32.mrf.mxu2  ;;  %v501_v36 = vmul.f32 %v485_v35, %v465_v21 }
  0xe4   : > { %v497_v23 = vmul.f32 %v481_v19, %v453_v20 }
  0xe5   : > { %v318_v22 = vpop.f32.mrf.mxu0 }
  0xe6   : > { %523 = vadd.xlane.f32.xlu1 %v497_v23  ;;  %v387_v24 = vpop.f32.mrf.mxu1 }
  0xe7   : > { %v482_v25 = vmul.f32 %v387_v24, %v318_v22 }
  0xea   : > { %v468_v30 = vpop.f32.mrf.mxu3 }
  0xeb   : > { %v456_v29 = vpop.f32.mrf.mxu2  ;;  %v502_v33 = vmul.f32 %v486_v27, %v468_v30 }
  0xec   : > { %v498_v32 = vmul.f32 %v482_v25, %v456_v29 }
  0xed   : > { %533 = vadd.xlane.f32.xlu0 %v502_v33 }
  0xee   : > { %529 = vadd.xlane.f32.xlu1 %v500_v31  ;;  %525 = vadd.xlane.f32.xlu2 %v498_v32 }
  0xf6   : > { %531 = vadd.xlane.f32.xlu2 %v501_v36 }
 0x109   : > { %v504_v37 = vpop.xlane.xlu0 %503 }
 0x10a   : > { %v553_v58 = vperm.slane %v504_v37, %v552_v48 }
 0x111   : > { %v506_v39 = vpop.xlane.xlu0 %505 }
 0x112   : > { %v555_v34 = vperm.slane %v506_v39, %v554_v49 }
 0x114   : > { %v557_v1 = vsel %vm556_vm2, %v555_v34, %v553_v58 }
 0x119   : > { %v508_v38 = vpop.xlane.xlu1 %507 }
 0x11a   : > { %v558_v53 = vperm.slane %v508_v38, %v552_v48 }
 0x121   : > { %v510_v42 = vpop.xlane.xlu1 %509 }
 0x122   : > { %v559_v50 = vperm.slane %v510_v42, %v554_v49 }
 0x124   : > { %v560_v59 = vsel %vm556_vm2, %v559_v50, %v558_v53 }
 0x125   : > { %v580_v4 = vsel %vm579_vm3, %v560_v59, %v557_v1 }
 0x129   : > { %v512_v41 = vpop.xlane.xlu2 %511 }
 0x12a   : > { %v561_v55 = vperm.slane %v512_v41, %v552_v48 }
 0x131   : > { %v514_v40 = vpop.xlane.xlu2 %513 }
 0x132   : > { %v562_v52 = vperm.slane %v514_v40, %v554_v49 }
 0x134   : > { %v563_v63 = vsel %vm556_vm2, %v562_v52, %v561_v55 }
 0x135   : > { %v582_v7 = vsel %vm581_vm4, %v563_v63, %v580_v4 }
 0x139   : > { %v516_v43 = vpop.xlane.xlu0 %515 }
 0x13a   : > { %v564_v60 = vperm.slane %v516_v43, %v552_v48 }
 0x141   : > { %v518_v28 = vpop.xlane.xlu1 %517 }
 0x142   : > { %v565_v54 = vperm.slane %v518_v28, %v554_v49 }
 0x144   : > { %v566_v2 = vsel %vm556_vm2, %v565_v54, %v564_v60 }
 0x145   : > { %v584_v9 = vsel %vm583_vm5, %v566_v2, %v582_v7 }
 0x148   : > { %v528_v44 = vpop.xlane.xlu0 %527 }
 0x149   : > { %v520_v47 = vpop.xlane.xlu2 %519  ;;  %v573_v10 = vperm.slane %v528_v44, %v552_v48 }
 0x14a   : > { %v567_v0 = vperm.slane %v520_v47, %v552_v48 }
 0x151   : > { %v522_v51 = vpop.xlane.xlu0 %521 }
 0x152   : > { %v568_v56 = vperm.slane %v522_v51, %v554_v49 }
 0x154   : > { %v569_v5 = vsel %vm556_vm2, %v568_v56, %v567_v0 }
 0x155   : > { %v586_v12 = vsel %vm585_vm6, %v569_v5, %v584_v9 }
 0x159   : > { %v524_v46 = vpop.xlane.xlu1 %523 }
 0x15a   : > { %v570_v3 = vperm.slane %v524_v46, %v552_v48 }
 0x160   : > { %v534_v11 = vpop.xlane.xlu0 %533 }
 0x161   : > { %v526_v57 = vpop.xlane.xlu2 %525  ;;  %v530_v61 = vpop.xlane.xlu1 %529  ;;  %v577_v16 = vperm.slane %v534_v11, %v554_v49 }
 0x162   : > { %v571_v62 = vperm.slane %v526_v57, %v554_v49  ;;  %v574_v6 = vperm.slane %v530_v61, %v554_v49 }
 0x164   : > { %v572_v8 = vsel %vm556_vm2, %v571_v62, %v570_v3  ;;  %v575_v13 = vsel %vm556_vm2, %v574_v6, %v573_v10 }
 0x165   : > { %v588_v15 = vsel %vm587_vm7, %v572_v8, %v586_v12 }
 0x166   : > { %v590_v19 = vsel %vm589_vm8, %v575_v13, %v588_v15 }
 0x169   : > { %v532_v14 = vpop.xlane.xlu2 %531 }
 0x16a   : > { %v576_v17 = vperm.slane %v532_v14, %v552_v48 }
 0x16c   : > { %v578_v18 = vsel %vm556_vm2, %v577_v16, %v576_v17 }
 0x16d   : > { %v592_v20 = vsel %vm591_vm9, %v578_v18, %v590_v19 }
 0x16e   : > { %v595_v21 = vsel %vm594_vm10, %v592_v20, 0.0 }
 0x16f   : > { %596 = vadd.xlane.f32.xlu1 %v595_v21 }
 0x1e2   : > { %v597_v23 = vpop.xlane.xlu1 %596 }
 0x1e3   : > { %599 = vst.msk [vmem:[%s197_s5] sm:$0xff] %vm598_vm11, %v597_v23 }
 0x1e4 PF: > { %s14_s15 = sadd.s32 1, %s731_s15  }
 0x1e5   : > { %p11_p5 = scmp.ge.s32.totalorder %s14_s15, 4  }
 0x1e7   :  { %13 = sbr.rel (!%p11_p5) target bundleno = 1 (0x1), region = 66 }

</bundles_post_ra>
